<compile_context>
chip_gen: v7x
topology: tpu7x:2x2x1
jax: 0.10.0
libtpu: 0.0.40
codegen_flags: <defaults>
</compile_context>

<pallas_src>
import jax
import jax.numpy as jnp
from jax import lax
from jax.experimental import pallas as pl
from jax.experimental.pallas import tpu as pltpu

BN_EPS = 0.0001


# ----------------------------- tiling helpers --------------------------------------

def _pick_row_tile(Ho, target):
    """Largest divisor of Ho that is a multiple of 8 and <= target; else the full Ho."""
    target = max(8, min(int(target), Ho))
    best = 0
    for d in range(8, target + 1, 8):
        if Ho % d == 0:
            best = d
    return best if best else Ho  # block == full dim is always a legal block shape


def _pick_w_tile(Wo, Cout, w_tile, target_lanes=256):
    """W tile such that WT divides Wo and WT*Cout is a multiple of 128 (lane dense)."""
    if w_tile is not None:
        assert Wo % w_tile == 0, "w_tile must divide Wo"
        assert (w_tile * Cout) % 128 == 0 or w_tile == Wo, \
            "w_tile*Cout must be a multiple of 128 (lane-dense stores) or the full Wo"
        return int(w_tile)
    cands = [d for d in range(1, Wo + 1) if Wo % d == 0 and (d * Cout) % 128 == 0]
    if not cands:
        return Wo
    return min(cands, key=lambda d: (abs(d * Cout - target_lanes), d))


def _vmem_limit_bytes(block_bytes):
    """Scoped-VMEM request from the actual block plan (double-buffered) + margin."""
    need = 2 * int(sum(block_bytes)) + (4 << 20)
    try:
        cap = int(pltpu.get_tpu_info().vmem_capacity_bytes)
    except Exception:
        cap = 64 << 20  # conservative (v7x per-TC)
    return int(min(max(need, 32 << 20), int(cap * 0.9)))


# ----------------------------- weight repack ----------------------------------------

def _band_weights(weight_oihw, P, WT, dtype):
    """Pack OIHW conv weights into a banded (KH, P*Cin, WT*Cout) matmul operand.

    band[kh, p*Cin + i, w*Cout + o] = weight[o, i, kh, p - w]  if 0 <= p - w < KW else 0
    so  out[h, w*Cout + o] = sum_kh x_tile[h + kh, :] @ band[kh]
    The band is shift-invariant, so one tile serves every W tile of the image.
    """
    Cout, Cin, KH, KW = weight_oihw.shape
    hwio = jnp.transpose(weight_oihw, (2, 3, 1, 0)).astype(jnp.float32)   # (KH, KW, Cin, Cout)
    p = jnp.arange(P)[:, None, None]
    w = jnp.arange(WT)[None, :, None]
    k = jnp.arange(KW)[None, None, :]
    sel = (p == w + k).astype(jnp.float32)                                # (P, WT, KW)
    band = jnp.einsum("pwk,hkio->hpiwo", sel, hwio)                       # (KH, P, Cin, WT, Cout)
    return band.reshape(KH, P * Cin, WT * Cout).astype(dtype)


# ----------------------------- kernels ----------------------------------------------

def _make_conv_kernel(*, TH, KH, LT, emit_stats, apply_relu):
    def kernel(x_ref, w_ref, o_ref, *stats):
        # x_ref:  (1, 1, Hp, P*Cin)     halo'd W tile, all padded rows resident
        # w_ref:  (KH, P*Cin, WT*Cout)  banded weights (shared across W tiles / samples)
        # o_ref:  (1, TH, WT*Cout)      conv output row tile (dense 128-lane stores)
        # stats:  optional (1,1,1,2,WT*Cout) per-tile column sums for GroupNorm
        h = pl.program_id(2)
        row0 = pl.multiple_of(h * TH, TH)

        acc = jnp.zeros((TH, LT), jnp.float32)
        for kh in range(KH):  # static unroll; each tap is only a sublane (row) offset
            rows = x_ref[0, 0, pl.ds(row0 + kh, TH), :]                   # (TH, P*Cin)
            acc = acc + jnp.dot(rows, w_ref[kh], preferred_element_type=jnp.float32)

        if emit_stats:
            # Stats come from the f32 accumulator while it is still in registers; the
            # cross-tile / cross-group combine happens outside the kernel.
            s_ref = stats[0]
            s_ref[0, 0, 0, pl.ds(0, 1), :] = jnp.sum(acc, axis=0, keepdims=True)
            s_ref[0, 0, 0, pl.ds(1, 1), :] = jnp.sum(acc * acc, axis=0, keepdims=True)

        if apply_relu:
            acc = jnp.clip(acc, 0.0, 6.0)
        o_ref[0] = acc.astype(o_ref.dtype)

    return kernel


def _make_norm_kernel(*, apply_relu):
    def kernel(y_ref, scale_ref, shift_ref, o_ref):
        # y_ref: (1, TH, L) conv rows; scale/shift: (1, 1, L) per-lane affine.
        y = y_ref[0].astype(jnp.float32)
        out = y * scale_ref[0] + shift_ref[0]
        if apply_relu:
            out = jnp.clip(out, 0.0, 6.0)
        o_ref[0] = out.astype(o_ref.dtype)

    return kernel


# ----------------------------- forward ----------------------------------------------

def _conv_bn_relu2d(x_nchw, weight_oihw, gamma=None, beta=None, *, padding=1,
                    stride=1, dilation=1, groups=1, is_bn=False, is_relu=True,
                    num_groups=32, eps=BN_EPS, row_tile=128, w_tile=None,
                    mxu_dtype=None):
    # TODO(synk): stride != 1, dilation != 1 and grouped conv are not implemented.
    assert stride == 1 and dilation == 1 and groups == 1, "module defaults only"
    N, Cin, H, W = x_nchw.shape
    Cout, Cin_w, KH, KW = weight_oihw.shape
    assert Cin_w == Cin

    if is_bn and Cout // num_groups == 0:
        num_groups = 1                      # same fallback as the PyTorch module
    G = num_groups if is_bn else 1
    assert (not is_bn) or Cout % G == 0, "GroupNorm needs Cout % num_groups == 0"
    Cpg = Cout // G

    dtype = x_nchw.dtype
    op_dtype = jnp.dtype(mxu_dtype) if mxu_dtype is not None else jnp.dtype(dtype)

    Hp, Wp = H + 2 * padding, W + 2 * padding
    Ho, Wo = Hp - KH + 1, Wp - KW + 1
    L = Wo * Cout

    WT = _pick_w_tile(Wo, Cout, w_tile)
    n_w = Wo // WT
    P = WT + KW - 1                         # halo'd padded columns per W tile
    WL = P * Cin                            # input lanes per W tile
    LT = WT * Cout                          # output lanes per W tile

    TH = _pick_row_tile(Ho, row_tile)
    n_h = Ho // TH

    # --- wrapper-side layout: NCHW -> NHWC -> pad -> halo'd W tiles, lanes = (w, cin) ---
    # TODO(synk): fold the zero padding / halo gather into the kernel to save this extra
    #             HBM pass over the activations.
    x = jnp.transpose(x_nchw, (0, 2, 3, 1))
    xp = jnp.pad(x, ((0, 0), (padding, padding), (padding, padding), (0, 0)))
    col = jnp.arange(n_w)[:, None] * WT + jnp.arange(P)[None, :]          # (n_w, P)
    x_tiles = xp[:, :, col, :]                                            # (N, Hp, n_w, P, Cin)
    x_tiles = jnp.transpose(x_tiles, (0, 2, 1, 3, 4)).reshape(N, n_w, Hp, WL)
    # Pre-cast MXU operands in the wrapper (bf16 path): halves DMA, no in-kernel casts.
    x_tiles = x_tiles.astype(op_dtype)
    w_band = _band_weights(weight_oihw, P, WT, op_dtype)                  # (KH, WL, LT)

    itm = jnp.dtype(op_dtype).itemsize
    out_itm = jnp.dtype(dtype).itemsize
    vmem1 = _vmem_limit_bytes([Hp * WL * itm, KH * WL * LT * itm,
                               TH * LT * out_itm, 2 * LT * 4])

    conv_kernel = _make_conv_kernel(TH=TH, KH=KH, LT=LT, emit_stats=is_bn,
                                    apply_relu=(is_relu and not is_bn))

    in_specs = [
        pl.BlockSpec((1, 1, Hp, WL), lambda n, j, h: (n, j, 0, 0)),   # halo'd W tile
        pl.BlockSpec((KH, WL, LT), lambda n, j, h: (0, 0, 0)),        # invariant band
    ]
    conv_out_shape = jax.ShapeDtypeStruct((N, Ho, L), dtype)
    conv_out_spec = pl.BlockSpec((1, TH, LT), lambda n, j, h: (n, h, j))

    if is_bn:
        out_shape = (conv_out_shape,
                     jax.ShapeDtypeStruct((N, n_h, n_w, 2, LT), jnp.float32))
        out_specs = (conv_out_spec,
                     pl.BlockSpec((1, 1, 1, 2, LT), lambda n, j, h: (n, h, j, 0, 0)))
    else:
        out_shape = conv_out_shape
        out_specs = conv_out_spec

    pass1 = pl.pallas_call(
        conv_kernel,
        out_shape=out_shape,
        grid_spec=pltpu.PrefetchScalarGridSpec(
            num_scalar_prefetch=0,
            grid=(N, n_w, n_h),
            in_specs=in_specs,
            out_specs=out_specs,
        ),
        compiler_params=pltpu.CompilerParams(
            dimension_semantics=("parallel", "parallel", "parallel"),
            vmem_limit_bytes=vmem1),
    )

    if not is_bn:
        out_flat = pass1(x_tiles, w_band)
    else:
        conv_flat, part = pass1(x_tiles, w_band)

        # --- tiny cross-tile / cross-group stat combine (plain JAX, negligible) ---
        part = part.reshape(N, n_h, n_w, 2, WT, Cout)
        sums = jnp.sum(part, axis=(1, 2, 4))                              # (N, 2, Cout)
        sums_g = jnp.sum(sums.reshape(N, 2, G, Cpg), axis=3)              # (N, 2, G)
        cnt = float(Ho * Wo * Cpg)
        mean_g = sums_g[:, 0, :] / cnt
        ex2_g = sums_g[:, 1, :] / cnt
        # NOTE: E[x^2]-E[x]^2 in f32, accumulated from the f32 conv accumulator; the
        # maximum() guards the tiny negative values cancellation can produce.
        var_g = jnp.maximum(ex2_g - mean_g * mean_g, 0.0)
        inv_g = lax.rsqrt(var_g + eps)

        g32 = (jnp.ones((Cout,), jnp.float32) if gamma is None
               else gamma.astype(jnp.float32))
        b32 = (jnp.zeros((Cout,), jnp.float32) if beta is None
               else beta.astype(jnp.float32))
        mean_c = jnp.repeat(mean_g, Cpg, axis=1)                          # (N, Cout)
        inv_c = jnp.repeat(inv_g, Cpg, axis=1)
        scale_c = g32[None, :] * inv_c
        shift_c = b32[None, :] - mean_c * scale_c
        scale_l = jnp.tile(scale_c, (1, Wo)).reshape(N, 1, L)             # lane = w*Cout+o
        shift_l = jnp.tile(shift_c, (1, Wo)).reshape(N, 1, L)

        # --- pass 2: streamed, fully parallel normalize + affine + ReLU6 ---
        vmem2 = _vmem_limit_bytes([2 * TH * L * out_itm, 2 * L * 4])
        norm_kernel = _make_norm_kernel(apply_relu=is_relu)
        out_flat = pl.pallas_call(
            norm_kernel,
            out_shape=jax.ShapeDtypeStruct((N, Ho, L), dtype),
            grid_spec=pltpu.PrefetchScalarGridSpec(
                num_scalar_prefetch=0,
                grid=(N, n_h),
                in_specs=[pl.BlockSpec((1, TH, L), lambda n, h: (n, h, 0)),
                          pl.BlockSpec((1, 1, L), lambda n, h: (n, 0, 0)),
                          pl.BlockSpec((1, 1, L), lambda n, h: (n, 0, 0))],
                out_specs=pl.BlockSpec((1, TH, L), lambda n, h: (n, h, 0)),
            ),
            compiler_params=pltpu.CompilerParams(
                dimension_semantics=("parallel", "parallel"),
                vmem_limit_bytes=vmem2),
            input_output_aliases={0: 0},   # normalize in place over the conv buffer
        )(conv_flat, scale_l, shift_l)

    # (N, Ho, Wo*Cout) -> NHWC -> NCHW to match PyTorch.
    out = out_flat.reshape(N, Ho, Wo, Cout)
    return jnp.transpose(out, (0, 3, 1, 2))


conv_bn_relu2d = jax.jit(
    _conv_bn_relu2d,
    static_argnames=("padding", "stride", "dilation", "groups", "is_bn", "is_relu",
                     "num_groups", "eps", "row_tile", "w_tile", "mxu_dtype"))


# ----------------------------- pure-JAX reference -----------------------------------

def reference(x_nchw, weight_oihw, gamma, beta, *, padding=1,
              is_bn=False, is_relu=True, num_groups=32, eps=BN_EPS):
    out = lax.conv_general_dilated(
        x_nchw, weight_oihw, window_strides=(1, 1),
        padding=[(padding, padding), (padding, padding)],
        dimension_numbers=("NCHW", "OIHW", "NCHW"))
    if is_bn:
        N, C, H, W = out.shape
        if C // num_groups == 0:
            num_groups = 1
        g = out.reshape(N, num_groups, (C // num_groups) * H * W)
        mean = g.mean(-1, keepdims=True)
        var = ((g - mean) ** 2).mean(-1, keepdims=True)
        g = (g - mean) / jnp.sqrt(var + eps)
        out = g.reshape(N, C, H, W) * gamma.reshape(1, C, 1, 1) + beta.reshape(1, C, 1, 1)
    if is_relu:
        out = jnp.clip(out, 0.0, 6.0)
    return out


# ----------------------------- self test --------------------------------------------

if __name__ == "__main__":
    key = jax.random.PRNGKey(0)
    k1, k2, k3, k4, k5 = jax.random.split(key, 5)

    # NCHW input, Conv2d(4 -> 8, k=3, pad=1, bias=False), small shapes.
    N, Cin, H, W = 2, 4, 16, 16
    Cout, K = 8, 3

    x = jax.random.normal(k1, (N, Cin, H, W), jnp.float32)
    x_wide = jax.random.normal(k5, (N, Cin, H, 2 * W), jnp.float32)   # exercises W tiling
    weight = jax.random.normal(k2, (Cout, Cin, K, K), jnp.float32) * 0.1
    gamma = 1.0 + 0.1 * jax.random.normal(k3, (Cout,), jnp.float32)
    beta = 0.1 * jax.random.normal(k4, (Cout,), jnp.float32)

    def check(xa, cfg, atol, rtol):
        out = conv_bn_relu2d(xa, weight, gamma, beta, padding=1, **cfg)
        out = jax.block_until_ready(out)
        ref_cfg = {k: cfg[k] for k in ("is_bn", "is_relu", "num_groups") if k in cfg}
        ref = reference(xa, weight, gamma, beta, padding=1, **ref_cfg)
        assert out.shape == ref.shape, (out.shape, ref.shape, cfg)
        err = float(jnp.max(jnp.abs(out - ref)))
        assert jnp.allclose(out, ref, atol=atol, rtol=rtol), (cfg, err)

    # fp32 MXU path: strict check against the fp32 reference.
    check(x, dict(is_bn=True, is_relu=True, num_groups=32), 1e-4, 1e-4)   # GN -> 1 group
    check(x, dict(is_bn=True, is_relu=True, num_groups=4, row_tile=8), 1e-4, 1e-4)
    check(x, dict(is_bn=False, is_relu=True), 1e-4, 1e-4)
    check(x, dict(is_bn=False, is_relu=False), 1e-4, 1e-4)
    # W-tiled + row-tiled path (2 lane tiles x 2 row tiles) on a wider input.
    check(x_wide, dict(is_bn=True, is_relu=True, num_groups=4, row_tile=8, w_tile=16),
          1e-4, 1e-4)
    # bf16 MXU operands (wrapper pre-cast): looser tolerance vs the fp32 reference.
    check(x, dict(is_bn=True, is_relu=True, num_groups=4, mxu_dtype=jnp.bfloat16),
          1e-1, 1e-1)

    print("KERNEL_OK")
</pallas_src>

<mosaic_0001>
module attributes {stable_mosaic.version = 11 : i64} {
  func.func @kernel(%arg0: i32, %arg1: i32, %arg2: i32, %arg3: memref<1x1x18x72xf32, #tpu.memory_space<vmem>>, %arg4: memref<3x72x128xf32, #tpu.memory_space<vmem>>, %arg5: memref<1x16x128xf32, #tpu.memory_space<vmem>>, %arg6: memref<1x1x1x2x128xf32, #tpu.memory_space<vmem>>) attributes {dimension_semantics = [#tpu.dimension_semantics<parallel>, #tpu.dimension_semantics<parallel>, #tpu.dimension_semantics<parallel>], iteration_bounds = array<i64: 2, 1, 1>, scalar_prefetch = 0 : i64, scratch_operands = 0 : i64, tpu.core_type = #tpu.core_type<tc>, window_params = [{transform_indices = @transform_0, window_bounds = array<i64: 1, 1, 18, 72>}, {pipeline_mode = #tpu.pipeline_mode<synchronous>, transform_indices = @transform_1, window_bounds = array<i64: 3, 72, 128>}, {transform_indices = @transform_2, window_bounds = array<i64: 1, 16, 128>}, {transform_indices = @transform_3, window_bounds = array<i64: 1, 1, 1, 2, 128>}]} {
    %c16_i32 = arith.constant 16 : i32
    %0 = arith.muli %arg2, %c16_i32 : i32
    %1 = tpu.assume_multiple %0, 16 : i32
    %cst = arith.constant 0.000000e+00 : f32
    %2 = vector.broadcast %cst : f32 to vector<16x128xf32>
    %c0_i32 = arith.constant 0 : i32
    %3 = arith.addi %1, %c0_i32 : i32
    %c0 = arith.constant 0 : index
    %c0_0 = arith.constant 0 : index
    %4 = arith.index_cast %3 : i32 to index
    %c0_1 = arith.constant 0 : index
    %5 = vector.load %arg3[%c0, %c0_0, %4, %c0_1] : memref<1x1x18x72xf32, #tpu.memory_space<vmem>>, vector<1x1x16x72xf32>
    %6 = vector.shape_cast %5 : vector<1x1x16x72xf32> to vector<16x72xf32>
    %c0_2 = arith.constant 0 : index
    %c0_3 = arith.constant 0 : index
    %c0_4 = arith.constant 0 : index
    %7 = vector.load %arg4[%c0_2, %c0_3, %c0_4] : memref<3x72x128xf32, #tpu.memory_space<vmem>>, vector<1x72x128xf32>
    %8 = vector.shape_cast %7 : vector<1x72x128xf32> to vector<72x128xf32>
    %cst_5 = arith.constant dense<0.000000e+00> : vector<16x128xf32>
    %9 = tpu.matmul %6, %8, %cst_5 {dimension_numbers = #tpu.dot_dimension_numbers<[1], [0], [0], [1], [0, 0, 1, 1], [], []>} : vector<16x72xf32>, vector<72x128xf32>, vector<16x128xf32> -> vector<16x128xf32>
    %10 = arith.addf %2, %9 : vector<16x128xf32>
    %c1_i32 = arith.constant 1 : i32
    %11 = arith.addi %1, %c1_i32 : i32
    %c0_6 = arith.constant 0 : index
    %c0_7 = arith.constant 0 : index
    %12 = arith.index_cast %11 : i32 to index
    %c0_8 = arith.constant 0 : index
    %13 = vector.load %arg3[%c0_6, %c0_7, %12, %c0_8] : memref<1x1x18x72xf32, #tpu.memory_space<vmem>>, vector<1x1x16x72xf32>
    %14 = vector.shape_cast %13 : vector<1x1x16x72xf32> to vector<16x72xf32>
    %c1 = arith.constant 1 : index
    %c0_9 = arith.constant 0 : index
    %c0_10 = arith.constant 0 : index
    %15 = vector.load %arg4[%c1, %c0_9, %c0_10] : memref<3x72x128xf32, #tpu.memory_space<vmem>>, vector<1x72x128xf32>
    %16 = vector.shape_cast %15 : vector<1x72x128xf32> to vector<72x128xf32>
    %cst_11 = arith.constant dense<0.000000e+00> : vector<16x128xf32>
    %17 = tpu.matmul %14, %16, %cst_11 {dimension_numbers = #tpu.dot_dimension_numbers<[1], [0], [0], [1], [0, 0, 1, 1], [], []>} : vector<16x72xf32>, vector<72x128xf32>, vector<16x128xf32> -> vector<16x128xf32>
    %18 = arith.addf %10, %17 : vector<16x128xf32>
    %c2_i32 = arith.constant 2 : i32
    %19 = arith.addi %1, %c2_i32 : i32
    %c0_12 = arith.constant 0 : index
    %c0_13 = arith.constant 0 : index
    %20 = arith.index_cast %19 : i32 to index
    %c0_14 = arith.constant 0 : index
    %21 = vector.load %arg3[%c0_12, %c0_13, %20, %c0_14] : memref<1x1x18x72xf32, #tpu.memory_space<vmem>>, vector<1x1x16x72xf32>
    %22 = vector.shape_cast %21 : vector<1x1x16x72xf32> to vector<16x72xf32>
    %c2 = arith.constant 2 : index
    %c0_15 = arith.constant 0 : index
    %c0_16 = arith.constant 0 : index
    %23 = vector.load %arg4[%c2, %c0_15, %c0_16] : memref<3x72x128xf32, #tpu.memory_space<vmem>>, vector<1x72x128xf32>
    %24 = vector.shape_cast %23 : vector<1x72x128xf32> to vector<72x128xf32>
    %cst_17 = arith.constant dense<0.000000e+00> : vector<16x128xf32>
    %25 = tpu.matmul %22, %24, %cst_17 {dimension_numbers = #tpu.dot_dimension_numbers<[1], [0], [0], [1], [0, 0, 1, 1], [], []>} : vector<16x72xf32>, vector<72x128xf32>, vector<16x128xf32> -> vector<16x128xf32>
    %26 = arith.addf %18, %25 : vector<16x128xf32>
    %cst_18 = arith.constant dense<0.000000e+00> : vector<128xf32>
    %27 = vector.multi_reduction <add>, %26, %cst_18 [0] : vector<16x128xf32> to vector<128xf32>
    %28 = vector.shape_cast %27 : vector<128xf32> to vector<1x128xf32>
    %c0_19 = arith.constant 0 : index
    %c0_20 = arith.constant 0 : index
    %c0_21 = arith.constant 0 : index
    %c0_22 = arith.constant 0 : index
    %c0_23 = arith.constant 0 : index
    %29 = vector.load %arg6[%c0_19, %c0_20, %c0_21, %c0_22, %c0_23] : memref<1x1x1x2x128xf32, #tpu.memory_space<vmem>>, vector<1x1x1x1x128xf32>
    %30 = vector.shape_cast %29 : vector<1x1x1x1x128xf32> to vector<1x128xf32>
    %31 = vector.shape_cast %28 : vector<1x128xf32> to vector<1x1x1x1x128xf32>
    tpu.vector_store %arg6[%c0_19, %c0_20, %c0_21, %c0_22, %c0_23], %31 {strides = array<i32>} : memref<1x1x1x2x128xf32, #tpu.memory_space<vmem>>, vector<1x1x1x1x128xf32>,
    %32 = arith.mulf %26, %26 : vector<16x128xf32>
    %cst_24 = arith.constant dense<0.000000e+00> : vector<128xf32>
    %33 = vector.multi_reduction <add>, %32, %cst_24 [0] : vector<16x128xf32> to vector<128xf32>
    %34 = vector.shape_cast %33 : vector<128xf32> to vector<1x128xf32>
    %c0_25 = arith.constant 0 : index
    %c0_26 = arith.constant 0 : index
    %c0_27 = arith.constant 0 : index
    %c1_28 = arith.constant 1 : index
    %c0_29 = arith.constant 0 : index
    %35 = vector.load %arg6[%c0_25, %c0_26, %c0_27, %c1_28, %c0_29] : memref<1x1x1x2x128xf32, #tpu.memory_space<vmem>>, vector<1x1x1x1x128xf32>
    %36 = vector.shape_cast %35 : vector<1x1x1x1x128xf32> to vector<1x128xf32>
    %37 = vector.shape_cast %34 : vector<1x128xf32> to vector<1x1x1x1x128xf32>
    tpu.vector_store %arg6[%c0_25, %c0_26, %c0_27, %c1_28, %c0_29], %37 {strides = array<i32>} : memref<1x1x1x2x128xf32, #tpu.memory_space<vmem>>, vector<1x1x1x1x128xf32>,
    %c0_30 = arith.constant 0 : index
    %c0_31 = arith.constant 0 : index
    %c0_32 = arith.constant 0 : index
    %38 = vector.load %arg5[%c0_30, %c0_31, %c0_32] : memref<1x16x128xf32, #tpu.memory_space<vmem>>, vector<1x16x128xf32>
    %39 = vector.shape_cast %38 : vector<1x16x128xf32> to vector<16x128xf32>
    %40 = vector.shape_cast %26 : vector<16x128xf32> to vector<1x16x128xf32>
    tpu.vector_store %arg5[%c0_30, %c0_31, %c0_32], %40 {strides = array<i32>} : memref<1x16x128xf32, #tpu.memory_space<vmem>>, vector<1x16x128xf32>,
    return
  }
  func.func @transform_0(%arg0: i32, %arg1: i32, %arg2: i32) -> (i32, i32, i32, i32) {
    %c0_i32 = arith.constant 0 : i32
    %c0_i32_0 = arith.constant 0 : i32
    %c0_i32_1 = arith.constant 0 : i32
    return %arg0, %arg1, %c0_i32, %c0_i32_0 : i32, i32, i32, i32
  }
  func.func @transform_1(%arg0: i32, %arg1: i32, %arg2: i32) -> (i32, i32, i32) {
    %c0_i32 = arith.constant 0 : i32
    %c0_i32_0 = arith.constant 0 : i32
    %c0_i32_1 = arith.constant 0 : i32
    %c0_i32_2 = arith.constant 0 : i32
    return %c0_i32, %c0_i32_0, %c0_i32_1 : i32, i32, i32
  }
  func.func @transform_2(%arg0: i32, %arg1: i32, %arg2: i32) -> (i32, i32, i32) {
    %c0_i32 = arith.constant 0 : i32
    return %arg0, %arg2, %arg1 : i32, i32, i32
  }
  func.func @transform_3(%arg0: i32, %arg1: i32, %arg2: i32) -> (i32, i32, i32, i32, i32) {
    %c0_i32 = arith.constant 0 : i32
    %c0_i32_0 = arith.constant 0 : i32
    %c0_i32_1 = arith.constant 0 : i32
    return %arg0, %arg2, %arg1, %c0_i32, %c0_i32_0 : i32, i32, i32, i32, i32
  }
}

module attributes {stable_mosaic.version = 11 : i64} {
  func.func @kernel(%arg0: i32, %arg1: i32, %arg2: memref<1x16x128xf32, #tpu.memory_space<vmem>>, %arg3: memref<1x1x128xf32, #tpu.memory_space<vmem>>, %arg4: memref<1x1x128xf32, #tpu.memory_space<vmem>>, %arg5: memref<1x16x128xf32, #tpu.memory_space<vmem>>) attributes {dimension_semantics = [#tpu.dimension_semantics<parallel>, #tpu.dimension_semantics<parallel>], iteration_bounds = array<i64: 2, 1>, scalar_prefetch = 0 : i64, scratch_operands = 0 : i64, tpu.core_type = #tpu.core_type<tc>, window_params = [{transform_indices = @transform_0, window_bounds = array<i64: 1, 16, 128>}, {transform_indices = @transform_1, window_bounds = array<i64: 1, 1, 128>}, {transform_indices = @transform_2, window_bounds = array<i64: 1, 1, 128>}, {transform_indices = @transform_3, window_bounds = array<i64: 1, 16, 128>}]} {
    %c0 = arith.constant 0 : index
    %c0_0 = arith.constant 0 : index
    %c0_1 = arith.constant 0 : index
    %0 = vector.load %arg2[%c0, %c0_0, %c0_1] : memref<1x16x128xf32, #tpu.memory_space<vmem>>, vector<1x16x128xf32>
    %1 = vector.shape_cast %0 : vector<1x16x128xf32> to vector<16x128xf32>
    %c0_2 = arith.constant 0 : index
    %c0_3 = arith.constant 0 : index
    %c0_4 = arith.constant 0 : index
    %2 = vector.load %arg3[%c0_2, %c0_3, %c0_4] : memref<1x1x128xf32, #tpu.memory_space<vmem>>, vector<1x1x128xf32>
    %3 = vector.shape_cast %2 : vector<1x1x128xf32> to vector<1x128xf32>
    %4 = vector.broadcast %3 : vector<1x128xf32> to vector<16x128xf32>
    %5 = arith.mulf %1, %4 : vector<16x128xf32>
    %c0_5 = arith.constant 0 : index
    %c0_6 = arith.constant 0 : index
    %c0_7 = arith.constant 0 : index
    %6 = vector.load %arg4[%c0_5, %c0_6, %c0_7] : memref<1x1x128xf32, #tpu.memory_space<vmem>>, vector<1x1x128xf32>
    %7 = vector.shape_cast %6 : vector<1x1x128xf32> to vector<1x128xf32>
    %8 = vector.broadcast %7 : vector<1x128xf32> to vector<16x128xf32>
    %9 = arith.addf %5, %8 : vector<16x128xf32>
    %cst = arith.constant 0.000000e+00 : f32
    %cst_8 = arith.constant 6.000000e+00 : f32
    %10 = vector.broadcast %cst : f32 to vector<16x128xf32>
    %11 = arith.maximumf %10, %9 : vector<16x128xf32>
    %12 = vector.broadcast %cst_8 : f32 to vector<16x128xf32>
    %13 = arith.minimumf %12, %11 : vector<16x128xf32>
    %c0_9 = arith.constant 0 : index
    %c0_10 = arith.constant 0 : index
    %c0_11 = arith.constant 0 : index
    %14 = vector.load %arg5[%c0_9, %c0_10, %c0_11] : memref<1x16x128xf32, #tpu.memory_space<vmem>>, vector<1x16x128xf32>
    %15 = vector.shape_cast %14 : vector<1x16x128xf32> to vector<16x128xf32>
    %16 = vector.shape_cast %13 : vector<16x128xf32> to vector<1x16x128xf32>
    tpu.vector_store %arg5[%c0_9, %c0_10, %c0_11], %16 {strides = array<i32>} : memref<1x16x128xf32, #tpu.memory_space<vmem>>, vector<1x16x128xf32>,
    return
  }
  func.func @transform_0(%arg0: i32, %arg1: i32) -> (i32, i32, i32) {
    %c0_i32 = arith.constant 0 : i32
    %c0_i32_0 = arith.constant 0 : i32
    return %arg0, %arg1, %c0_i32 : i32, i32, i32
  }
  func.func @transform_1(%arg0: i32, %arg1: i32) -> (i32, i32, i32) {
    %c0_i32 = arith.constant 0 : i32
    %c0_i32_0 = arith.constant 0 : i32
    %c0_i32_1 = arith.constant 0 : i32
    return %arg0, %c0_i32, %c0_i32_0 : i32, i32, i32
  }
  func.func @transform_2(%arg0: i32, %arg1: i32) -> (i32, i32, i32) {
    %c0_i32 = arith.constant 0 : i32
    %c0_i32_0 = arith.constant 0 : i32
    %c0_i32_1 = arith.constant 0 : i32
    return %arg0, %c0_i32, %c0_i32_0 : i32, i32, i32
  }
  func.func @transform_3(%arg0: i32, %arg1: i32) -> (i32, i32, i32) {
    %c0_i32 = arith.constant 0 : i32
    %c0_i32_0 = arith.constant 0 : i32
    return %arg0, %arg1, %c0_i32 : i32, i32, i32
  }
}

</mosaic_0001>

<bundles_post_ra>
// kernel: _conv_bn_relu2d.2
= control target key start
LH: loop header
LB: loop body
LE: loop exit
PB: predicated region body
PF: predicated region fallthrough
CT: control target
= control target key end

     0   :  { %s976_s12 = smov 0   ;;  %s978_s13 = smov 0   ;;  %s1112_s0 = inlined_call_operand.vmem [shape: f32[2,1,18,72], index: 0, kind: input, shape index: {}]   ;;  %s1113_s1 = inlined_call_operand.vmem [shape: f32[3,72,128], index: 1, kind: input, shape index: {}]   ;;  %s1114_s2 = inlined_call_operand.vmem [shape: f32[2,16,128], index: 2, kind: output, shape index: {0}]   ;;  %s1115_s3 = inlined_call_operand.vmem [shape: f32[2,1,1,2,128], index: 3, kind: output, shape index: {1}]  }
   0x1   :  { %s980_s14 = smov 0  }
   0x2 LB: > { %s33_s15 = sadd.s32 1, %s950_s13  ;;  %p723_p0 = scmp.ge.s32.totalorder %s954_s14, 1  ;;  %s954_s14 = sphi %s980_s14, %s14_s14   ;;  %s950_s13 = sphi %s978_s13, %s1117_s13   ;;  %s946_s12 = sphi %s976_s12, %s1116_s12  }
   0x3   : > { %p35_p1 = scmp.ge.s32.totalorder %s33_s15, 2  ;;  %p173_p2 = scmp.lt.s32.totalorder %s954_s14, 3 }
   0x5   : > { %s1119_s15 = smov (%p35_p1, %s33_s15), 0  ;;  %p174_p3 = pnand %p723_p0, %p173_p2 }
   0x6   : > { %v254_v0 = vld [vmem:[%s1113_s1] sm:$0xff] (!%p174_p3)  ;;  %v255_v1 = vld [vmem:[%s1113_s1 + $0x8] sm:$0xff] (!%p174_p3)  ;;  %v256_v2 = vld [vmem:[%s1113_s1 + $0x10] sm:$0xff] (!%p174_p3)  ;;  %p218_p4 = scmp.lt.s32.totalorder (!%p174_p3), %s946_s12, 1  ;;  %vm277_vm0 = vcmask (!%p174_p3), 588800  }
   0x7   : > { %177 = sbr.rel (%p174_p3) target bundleno = 277 (0x115), region = 28  ;;  %v871_v3 = vpack.c.bf16 (!%p174_p3), %v255_v1, %v254_v0  ;;  %v257_v4 = vld [vmem:[%s1113_s1 + $0x18] sm:$0xff] (!%p174_p3)  ;;  %v258_v6 = vld [vmem:[%s1113_s1 + $0x20] sm:$0xff] (!%p174_p3)  ;;  %v259_v7 = vld [vmem:[%s1113_s1 + $0x28] sm:$0xff] (!%p174_p3) }
   0x8   : > { %v875_v5 = vpack.c.bf16 (!%p174_p3), %v257_v4, %v256_v2  ;;  %v730_v8 = vld [vmem:[%s1113_s1 + $0x48] sm:$0xff] (!%p174_p3)  ;;  %v731_v9 = vld [vmem:[%s1113_s1 + $0x50] sm:$0xff] (!%p174_p3)  ;;  %v732_v11 = vld [vmem:[%s1113_s1 + $0x58] sm:$0xff] (!%p174_p3)  ;;  %v879_v13 = vpack.c.bf16 (!%p174_p3), %v259_v7, %v258_v6 }
   0x9   : > { %872 = vmatprep.subr.bf16.mxu0 (!%p174_p3), %v871_v3  ;;  %v855_v10 = vpack.c.bf16 (!%p174_p3), %v731_v9, %v730_v8  ;;  %v733_v12 = vld [vmem:[%s1113_s1 + $0x60] sm:$0xff] (!%p174_p3)  ;;  %v734_v15 = vld [vmem:[%s1113_s1 + $0x68] sm:$0xff] (!%p174_p3)  ;;  %v260_v16 = vld [vmem:[%s1113_s1 + $0x30] sm:$0xff] (!%p174_p3) }
   0xa   : > { %874 = vmatpush3.bf16.msra.mxu0 (!%p174_p3), %v871_v3  ;;  %v859_v14 = vpack.c.bf16 (!%p174_p3), %v733_v12, %v732_v11  ;;  %v261_v17 = vld [vmem:[%s1113_s1 + $0x38] sm:$0xff] (!%p174_p3)  ;;  %v735_v18 = vld [vmem:[%s1113_s1 + $0x70] sm:$0xff] (!%p174_p3)  ;;  %v737_v23 = vld [vmem:[%s1113_s1 + $0x80] sm:$0xff] (!%p174_p3) }
   0xb   : > { %876 = vmatprep.subr.bf16.mxu0 (!%p174_p3), %v875_v5  ;;  %856 = vmatprep.subr.bf16.mxu1 (!%p174_p3), %v855_v10  ;;  %v863_v20 = vpack.c.bf16 (!%p174_p3), %v735_v18, %v734_v15  ;;  %v883_v21 = vpack.c.bf16 (!%p174_p3), %v261_v17, %v260_v16  ;;  %v736_v22 = vld [vmem:[%s1113_s1 + $0x78] sm:$0xff] (!%p174_p3)  ;;  %v262_v26 = vld [vmem:[%s1113_s1 + $0x40] sm:$0xff] (!%p174_p3)  ;;  %v745_v27 = vld [vmem:[%s1113_s1 + $0x90] sm:$0xff] (!%p174_p3) }
   0xc   : > { %858 = vmatpush3.bf16.msra.mxu1 (!%p174_p3), %v855_v10  ;;  %v867_v25 = vpack.c.bf16 (!%p174_p3), %v737_v23, %v736_v22  ;;  %v746_v28 = vld [vmem:[%s1113_s1 + $0x98] sm:$0xff] (!%p174_p3)  ;;  %v747_v29 = vld [vmem:[%s1113_s1 + $0xa0] sm:$0xff] (!%p174_p3)  ;;  %v748_v30 = vld [vmem:[%s1113_s1 + $0xa8] sm:$0xff] (!%p174_p3) }
   0xd   : > { %860 = vmatprep.subr.bf16.mxu1 (!%p174_p3), %v859_v14  ;;  %v887_v31 = vpack.c.bf16 (!%p174_p3), %v746_v28, %v745_v27  ;;  %v738_v32 = vld [vmem:[%s1113_s1 + $0x88] sm:$0xff] (!%p174_p3)  ;;  %v891_v34 = vpack.c.bf16 (!%p174_p3), %v748_v30, %v747_v29  ;;  %v749_v36 = vld [vmem:[%s1113_s1 + $0xb0] sm:$0xff] (!%p174_p3)  ;;  %v750_v37 = vld [vmem:[%s1113_s1 + $0xb8] sm:$0xff] (!%p174_p3) }
   0xe   : > { %s1121_s12 = smov (!%p218_p4, %s946_s12), 1  ;;  %878 = vmatpush3.bf16.msra.mxu0 %v875_v5  ;;  %v895_v39 = vpack.c.bf16 %v750_v37, %v749_v36  ;;  %v751_v40 = vld [vmem:[%s1113_s1 + $0xc0] sm:$0xff]  ;;  %v752_v41 = vld [vmem:[%s1113_s1 + $0xc8] sm:$0xff]  ;;  %v753_v43 = vld [vmem:[%s1113_s1 + $0xd0] sm:$0xff] }
   0xf   : > { %s907_s5 = smul.u32 24, %s1121_s12  ;;  %880 = vmatprep.subr.bf16.mxu0 %v879_v13  ;;  %v899_v42 = vpack.c.bf16 %v752_v41, %v751_v40  ;;  %s758_s29 = sshll.u32 %s1121_s12, 4 }
  0x10   : > { %862 = vmatpush3.bf16.msra.mxu1 %v859_v14 }
  0x11   : > { %s1039_s22 = scalar_lea.vmem %s1112_s0, %s907_s5  ;;  %864 = vmatprep.subr.bf16.mxu1 %v863_v20  ;;  %s238_s5 = scalar_lea.vmem %s1114_s2, %s758_s29 }
  0x12   : > { %v252_v19 = vld [vmem:[%s1039_s22] sm:$0xff]  ;;  %882 = vmatpush3.bf16.msra.mxu0 %v879_v13  ;;  %v253_v33 = vld [vmem:[%s1039_s22 + $0x8] sm:$0xff] }
  0x13   : > { %831 = vmatprep.mubr.msk.f32.mxu0 %vm277_vm0, %v252_v19  ;;  %v728_v24 = vld [vmem:[%s1039_s22 + $0x1] sm:$0xff]  ;;  %884 = vmatprep.subr.bf16.mxu0 %v883_v21  ;;  %v729_v38 = vld [vmem:[%s1039_s22 + $0x9] sm:$0xff] }
  0x14   : > { %810 = vmatprep.mubr.msk.f32.mxu1 %vm277_vm0, %v728_v24  ;;  %866 = vmatpush3.bf16.msra.mxu1 %v863_v20  ;;  %v743_v35 = vld [vmem:[%s1039_s22 + $0x2] sm:$0xff]  ;;  %v744_v44 = vld [vmem:[%s1039_s22 + $0xa] sm:$0xff]  ;;  %s727_s22 = sshll.u32 %s1121_s12, 1 }
  0x15   : > { %868 = vmatprep.subr.bf16.mxu1 %v867_v25  ;;  %s249_s8 = scalar_lea.vmem %s1115_s3, %s727_s22 }
  0x16   : > { %886 = vmatpush3.bf16.msra.mxu0 %v883_v21 }
  0x17   : > { %829 = vmatprep.subr.mxu0 %v262_v26 }
  0x18   : > { %870 = vmatpush3.bf16.msra.mxu1 %v867_v25 }
  0x19   : > { %808 = vmatprep.subr.mxu1 %v738_v32 }
  0x1a   : > { %830 = vmatpush3.msra.mxu0 %v262_v26 }
  0x1b   : > { %888 = vmatprep.subr.bf16.mxu0 %v887_v31  ;;  %832 = vmatmul.mubr.msk.f32.vlgmr.msra.gmra.mrb[0].mxu0 %vm277_vm0, %v253_v33 }
  0x1c   : > { %890 = vmatpush3.bf16.msra.mxu0 %v887_v31  ;;  %852 = vmatprep.mubr.msk.f32.mxu0 %vm277_vm0, %v743_v35 }
  0x1d   : > { %892 = vmatprep.subr.bf16.mxu0 %v891_v34  ;;  %809 = vmatpush3.msra.mxu1 %v738_v32 }
  0x1e   : > { %811 = vmatmul.mubr.msk.f32.vlgmr.msra.gmra.mrb[0].mxu1 %vm277_vm0, %v729_v38 }
  0x20   : > { %894 = vmatpush3.bf16.msra.mxu0 %v891_v34 }
  0x21   : > { %896 = vmatprep.subr.bf16.mxu0 %v895_v39 }
  0x24   : > { %898 = vmatpush3.bf16.msra.mxu0 %v895_v39 }
  0x25   : > { %900 = vmatprep.subr.bf16.mxu0 %v899_v42 }
  0x28   : > { %902 = vmatpush3.bf16.msra.mxu0 %v899_v42 }
  0x29   : > { %850 = vmatprep.subr.mxu0 %v753_v43 }
  0x2c   : > { %851 = vmatpush3.msra.mxu0 %v753_v43 }
  0x2d   : > { %853 = vmatmul.mubr.msk.f32.vlgmr.msra.gmra.mrb[0].mxu0 %vm277_vm0, %v744_v44 }
  0xf1   : > { %v812_v45 = vpop.f32.mrb[0].mxu1 }
  0xf2   : > { %v350_v46 = vpop.f32.mrb[1].mxu1 }
 0x100   : > { %v854_v47 = vpop.f32.mrb[0].mxu0 }
 0x101   : > { %v903_v48 = vadd.f32 %v854_v47, %v812_v45  ;;  %v526_v49 = vpop.f32.mrb[1].mxu0 }
 0x102   : > { %v904_v50 = vadd.f32 %v526_v49, %v350_v46 }
 0x103   : > { %v546_v51 = vmul.f32 %v903_v48, %v903_v48  ;;  %556 = vst [vmem:[%s238_s5 + $0x8] sm:$0xff] %v903_v48 }
 0x104   : > { %v537_v52 = vadd.f32 %v904_v50, %v903_v48  ;;  %v545_v53 = vmul.f32 %v904_v50, %v904_v50  ;;  %555 = vst [vmem:[%s238_s5] sm:$0xff] %v904_v50 }
 0x106   : > { %v538_v54 = vrot.slane %v537_v52, 4  ;;  %v547_v55 = vadd.f32 %v546_v51, %v545_v53 }
 0x108   : > { %v539_v56 = vadd.f32 %v538_v54, %v537_v52  ;;  %v548_v57 = vrot.slane %v547_v55, 4 }
 0x10a   : > { %v540_v58 = vrot.slane %v539_v56, 2  ;;  %v549_v59 = vadd.f32 %v548_v57, %v547_v55 }
 0x10c   : > { %v541_v60 = vadd.f32 %v540_v58, %v539_v56  ;;  %v550_v61 = vrot.slane %v549_v59, 2 }
 0x10e   : > { %v542_v62 = vrot.slane %v541_v60, 1  ;;  %v551_v63 = vadd.f32 %v550_v61, %v549_v59 }
 0x110   : > { %v543_v0 = vadd.f32 %v542_v62, %v541_v60  ;;  %v552_v1 = vrot.slane %v551_v63, 1 }
 0x112   : > { %544 = vst [vmem:[%s249_s8] sm:$0x1] %v543_v0  ;;  %v553_v2 = vadd.f32 %v552_v1, %v551_v63 }
 0x114   : > { %554 = vst [vmem:[%s249_s8 + $0x1] sm:$0x1] %v553_v2 }
 0x115 PF: > { %s14_s14 = sadd.s32 1, %s954_s14   ;;  %s1116_s12 = smov %s950_s13 }
 0x116   : > { %p11_p5 = scmp.ge.s32.totalorder %s14_s14, 4   ;;  %s1117_s13 = smov %s1119_s15 }
 0x118   :  { %13 = sbr.rel (!%p11_p5) target bundleno = 2 (0x2), region = 75 }

// kernel: _conv_bn_relu2d.3
= control target key start
LH: loop header
LB: loop body
LE: loop exit
PB: predicated region body
PF: predicated region fallthrough
CT: control target
= control target key end

     0   :  { %s452_s12 = smov 0   ;;  %s454_s13 = smov 0   ;;  %s488_s0 = inlined_call_operand.vmem [shape: f32[2,16,128], index: 0, kind: input, shape index: {}, may-alias: {0,3}]   ;;  %s489_s1 = inlined_call_operand.vmem [shape: f32[2,1,128], index: 1, kind: input, shape index: {}]   ;;  %s490_s2 = inlined_call_operand.vmem [shape: f32[2,1,128], index: 2, kind: input, shape index: {}]   ;;  %s491_s3 = inlined_call_operand.vmem [shape: f32[2,16,128], index: 3, kind: output, shape index: {}, may-alias: {0,3}]  }
   0x1   :  { %s456_s14 = smov 0  }
   0x2 LB: > { %s25_s15 = sadd.s32 1, %s426_s13  ;;  %p373_p0 = scmp.ge.s32.totalorder %s430_s14, 1  ;;  %s430_s14 = sphi %s456_s14, %s13_s14   ;;  %s426_s13 = sphi %s454_s13, %s493_s13   ;;  %s422_s12 = sphi %s452_s12, %s492_s12  }
   0x3   : > { %p27_p1 = scmp.ge.s32.totalorder %s25_s15, 2  ;;  %p174_p2 = scmp.lt.s32.totalorder %s430_s14, 3 }
   0x5   : > { %s495_s15 = smov (%p27_p1, %s25_s15), 0  ;;  %p175_p3 = pnand %p373_p0, %p174_p2 }
   0x6   : > { %p213_p4 = scmp.lt.s32.totalorder (!%p175_p3), %s422_s12, 1 }
   0x7   : > { %178 = sbr.rel (%p175_p3) target bundleno = 27 (0x1b), region = 32 }
   0xe   : > { %s497_s12 = smov (!%p213_p4, %s422_s12), 1 }
   0xf   : > { %s382_s16 = sshll.u32 %s497_s12, 4  ;;  %s224_s19 = scalar_lea.vmem %s489_s1, %s497_s12 }
  0x10   : > { %s220_s22 = scalar_lea.vmem %s488_s0, %s382_s16  ;;  %s227_s25 = scalar_lea.vmem %s490_s2, %s497_s12  ;;  %v378_v0 = vld [vmem:[%s224_s19] ss:$0 sm:$0xff] }
  0x11   : > { %v238_v1 = vld [vmem:[%s220_s22] sm:$0xff]  ;;  %v239_v2 = vld [vmem:[%s220_s22 + $0x8] sm:$0xff]  ;;  %s236_s28 = scalar_lea.vmem %s491_s3, %s382_s16 }
  0x12   : > { %v379_v3 = vld [vmem:[%s227_s25] ss:$0 sm:$0xff]  ;;  %v247_v4 = vmul.f32 %v378_v0, %v238_v1  ;;  %v248_v5 = vmul.f32 %v378_v0, %v239_v2 }
  0x14   : > { %v256_v6 = vadd.f32 %v379_v3, %v247_v4  ;;  %v257_v7 = vadd.f32 %v379_v3, %v248_v5 }
  0x16   : > { %v258_v8 = vmax.f32 %v256_v6, 0.0  ;;  %v259_v9 = vmax.f32 %v257_v7, 0.0 }
  0x18   : > { %v260_v10 = vmin.f32 %v258_v8, 6.0  ;;  %v261_v11 = vmin.f32 %v259_v9, 6.0 }
  0x1a   : > { %262 = vst [vmem:[%s236_s28] sm:$0xff] %v260_v10  ;;  %263 = vst [vmem:[%s236_s28 + $0x8] sm:$0xff] %v261_v11 }
  0x1b PF: > { %s13_s14 = sadd.s32 1, %s430_s14   ;;  %s492_s12 = smov %s426_s13 }
  0x1c   : > { %p10_p5 = scmp.ge.s32.totalorder %s13_s14, 4   ;;  %s493_s13 = smov %s495_s15 }
  0x1e   :  { %12 = sbr.rel (!%p10_p5) target bundleno = 2 (0x2), region = 68 }

</bundles_post_ra>
